<compile_context>
chip_gen: v7x
topology: tpu7x:2x2x1
jax: 0.10.0
libtpu: 0.0.40
codegen_flags: <defaults>
</compile_context>

<pallas_src>
import functools

import jax
import jax.numpy as jnp
from jax.experimental import pallas as pl
from jax.experimental.pallas import tpu as pltpu

_SQRT_2_OVER_PI = 0.7978845608028654
_GELU_C = 0.044715


def _gpt_ffn_kernel(x_ref, w1_ref, b1_ref, w2_ref, b2_ref, o_ref, acc_ref,
                    *, n_sub, sub_th, gelu_dtype):
    """One (token-tile i, H-tile j) grid step of y = GELU_tanh(x@w1+b1) @ w2 + b2.

    x_ref : (tm, E)   token tile (resident across the H axis)
    w1_ref: (E, th)   up-projection slice,   b1_ref: (1, th)
    w2_ref: (th, E)   down-projection slice, b2_ref: (1, E)
    acc_ref: (tm, E)  f32 accumulator over the H grid axis
    """
    j = pl.program_id(1)
    x = x_ref[...]

    # Sub-tile the H slice (static unroll) so the next sub-slice's MXU pushes
    # can overlap the current sub-slice's GELU (VPU/EUP) chain.
    partial = None
    for s in range(n_sub):
        lo = s * sub_th
        w1_s = w1_ref[:, lo:lo + sub_th]          # (E, sub_th)  static slice = view
        b1_s = b1_ref[:, lo:lo + sub_th]          # (1, sub_th)
        w2_s = w2_ref[lo:lo + sub_th, :]          # (sub_th, E)

        # Up-projection on the MXU: native-dtype operands, f32 accumulation.
        h = jnp.dot(x, w1_s, preferred_element_type=jnp.float32)
        h = (h + b1_s.astype(jnp.float32)).astype(gelu_dtype)

        # GELU (tanh approximation == torch approximate='tanh').
        g = 0.5 * h * (1.0 + jnp.tanh(_SQRT_2_OVER_PI * (h + _GELU_C * (h * h * h))))

        # Down-projection, f32 partial sum.
        p = jnp.dot(g.astype(w2_s.dtype), w2_s, preferred_element_type=jnp.float32)
        partial = p if partial is None else partial + p

    # First H step overwrites (no zero-init store/reload); later steps accumulate.
    @pl.when(j == 0)
    def _first():
        acc_ref[...] = partial

    @pl.when(j > 0)
    def _rest():
        acc_ref[...] += partial

    @pl.when(j == pl.num_programs(1) - 1)
    def _finalize():
        o_ref[...] = (acc_ref[...] + b2_ref[...].astype(jnp.float32)).astype(o_ref.dtype)


def _tpu_generation():
    try:
        kind = jax.devices()[0].device_kind.lower()
    except Exception:
        return None
    for g in (7, 6, 5, 4):
        if str(g) in kind:
            return g
    return None


def _defaults_for(gen):
    """Returns (tm, th, vmem_limit_bytes, split_tokens_for_two_cores)."""
    if gen is not None and gen >= 7:
        # 64 MiB physical VMEM per TensorCore; leave headroom for compiler scratch.
        return 384, 512, 48 * 1024 * 1024, True
    if gen == 6:
        return 512, 1024, 100 * 1024 * 1024, False   # 128 MiB physical VMEM
    if gen in (4, 5):
        return 256, 1024, 96 * 1024 * 1024, False    # 128 MiB physical VMEM
    return 256, 512, 32 * 1024 * 1024, False          # unknown: conservative


def _sublane_multiple(dtype):
    return {4: 8, 2: 16, 1: 32}.get(jnp.dtype(dtype).itemsize, 8)


def _estimate_vmem_bytes(tm, th, E, H, itemsize):
    io = 2 * (tm * E + E * th + th + th * E + E + tm * E) * itemsize  # double-buffered tiles
    acc = tm * E * 4                                                  # f32 accumulator
    interm = 2 * tm * min(th, 2048) * 4                               # h/g intermediates headroom
    return io + acc + interm


def _choose_h_tile(H, th_req, tm, E, itemsize, budget):
    def fits(th):
        return _estimate_vmem_bytes(tm, th, E, H, itemsize) <= budget

    if fits(H):
        return H                                   # resident weights: DMA'd once per launch
    divs = [d for d in range(128, H, 128) if H % d == 0]
    for th in sorted((d for d in divs if d <= th_req), reverse=True):
        if fits(th):
            return th
    for th in sorted(divs):
        if fits(th):
            return th
    # TODO(synk): zero-pad H for hidden dims with no 128-multiple divisor.
    return H


def gpt_feedforward(x, w1, b1, w2, b2, *, tm=None, th=None, vmem_limit_bytes=None):
    """x: (T, E); w1: (E, H); b1: (H,); w2: (H, E); b2: (E,).  Returns (T, E)."""
    T, E = x.shape
    H = w1.shape[1]

    gen = _tpu_generation()
    tm_d, th_d, vmem_d, split_two = _defaults_for(gen)
    tm_req = tm if tm is not None else tm_d
    th_req = th if th is not None else th_d
    vmem_limit = int(vmem_limit_bytes if vmem_limit_bytes is not None else vmem_d)

    # Token tile: clamp to (padded) T and round to the dtype's sublane multiple.
    sub = _sublane_multiple(x.dtype)
    tm_ = min(tm_req, pl.cdiv(T, sub) * sub)
    tm_ = max(sub, (tm_ // sub) * sub)
    # v7x shards the "parallel" token axis over two TensorCores: make sure there
    # are at least two token tiles when T allows it.
    if split_two and pl.cdiv(T, tm_) < 2 and T > sub:
        tm_ = pl.cdiv(pl.cdiv(T, 2), sub) * sub
    Tp = pl.cdiv(T, tm_) * tm_
    x_p = jnp.pad(x, ((0, Tp - T), (0, 0))) if Tp != T else x

    # Hidden tile: resident (full H) when the footprint fits the VMEM budget,
    # otherwise stream H in lane-aligned slices and reduce into the accumulator.
    itemsize = jnp.dtype(w1.dtype).itemsize
    if th is not None and (th == H or (H % th == 0 and th % 128 == 0)):
        th_ = th
    else:
        th_ = _choose_h_tile(H, th_req, tm_, E, itemsize, int(0.8 * vmem_limit))
    num_h = H // th_

    # In-body sub-tiling of th so the GELU chain overlaps the MXU.
    n_sub = 1
    for cand in (4, 2):
        s_ = th_ // cand
        if th_ % cand == 0 and s_ % 128 == 0 and s_ >= 256:
            n_sub = cand
            break
    sub_th = th_ // n_sub

    # bf16 GELU only where the VPU/EUP are bf16-native (v6e / v7x); f32 elsewhere.
    low_prec_gelu = (gen is not None and gen >= 6
                     and jnp.dtype(w2.dtype) == jnp.dtype(jnp.bfloat16))
    gelu_dtype = w2.dtype if low_prec_gelu else jnp.float32

    b1_2d = b1.reshape(1, H)
    b2_2d = b2.reshape(1, E)

    kernel = functools.partial(_gpt_ffn_kernel, n_sub=n_sub, sub_th=sub_th,
                               gelu_dtype=gelu_dtype)

    out = pl.pallas_call(
        kernel,
        out_shape=jax.ShapeDtypeStruct((Tp, E), x.dtype),
        grid_spec=pltpu.PrefetchScalarGridSpec(
            num_scalar_prefetch=0,
            grid=(Tp // tm_, num_h),
            in_specs=[
                pl.BlockSpec((tm_, E), lambda i, j: (i, 0)),   # x token tile
                pl.BlockSpec((E, th_), lambda i, j: (0, j)),   # w1 H-slice (resident if num_h==1)
                pl.BlockSpec((1, th_), lambda i, j: (0, j)),   # b1 H-slice
                pl.BlockSpec((th_, E), lambda i, j: (j, 0)),   # w2 H-slice
                pl.BlockSpec((1, E), lambda i, j: (0, 0)),     # b2 (resident)
            ],
            out_specs=pl.BlockSpec((tm_, E), lambda i, j: (i, 0)),
            scratch_shapes=[pltpu.VMEM((tm_, E), jnp.float32)],
        ),
        compiler_params=pltpu.CompilerParams(
            dimension_semantics=("parallel", "arbitrary"),
            vmem_limit_bytes=vmem_limit,
        ),
    )(x_p, w1, b1_2d, w2, b2_2d)

    return out[:T] if Tp != T else out


if __name__ == "__main__":
    # Small config consistent with the module: embed_dim=128, hidden = 4*embed.
    batch, seq, embed_dim = 2, 8, 128
    hidden_dim = 4 * embed_dim

    key = jax.random.PRNGKey(0)
    kx, k1, kb1, k2, kb2 = jax.random.split(key, 5)

    x = jax.random.normal(kx, (batch, seq, embed_dim), dtype=jnp.float32)
    # nn.Linear stores weight as (out, in); pre-transpose to (in, out) for
    # right-multiplication inside the kernel.
    w1 = (jax.random.normal(k1, (hidden_dim, embed_dim), dtype=jnp.float32) * 0.05).T  # (E, H)
    b1 = jax.random.normal(kb1, (hidden_dim,), dtype=jnp.float32) * 0.05
    w2 = (jax.random.normal(k2, (embed_dim, hidden_dim), dtype=jnp.float32) * 0.05).T  # (H, E)
    b2 = jax.random.normal(kb2, (embed_dim,), dtype=jnp.float32) * 0.05

    x_flat = x.reshape(batch * seq, embed_dim)

    # Pure-JAX reference (tanh-approximate GELU == torch approximate='tanh').
    ref = jax.nn.gelu(x_flat @ w1 + b1, approximate=True) @ w2 + b2

    # 1) f32, auto config (weights resident in VMEM at this size).
    y_flat = gpt_feedforward(x_flat, w1, b1, w2, b2)
    jax.block_until_ready(y_flat)
    assert jnp.allclose(y_flat, ref, atol=1e-4, rtol=1e-4), "f32 resident-weights mismatch"

    # 2) f32, forced H streaming (exercises the accumulator / j>0 path).
    y_stream = gpt_feedforward(x_flat, w1, b1, w2, b2, th=256)
    jax.block_until_ready(y_stream)
    assert jnp.allclose(y_stream, ref, atol=1e-4, rtol=1e-4), "f32 streamed-H mismatch"

    # 3) bf16 operands (fast MXU path; halves HBM/VMEM traffic).
    bf = jnp.bfloat16
    y_bf = gpt_feedforward(x_flat.astype(bf), w1.astype(bf), b1.astype(bf),
                           w2.astype(bf), b2.astype(bf))
    jax.block_until_ready(y_bf)
    f32 = jnp.float32
    ref_bf = (jax.nn.gelu(x_flat.astype(bf).astype(f32) @ w1.astype(bf).astype(f32)
                          + b1.astype(bf).astype(f32), approximate=True)
              @ w2.astype(bf).astype(f32) + b2.astype(bf).astype(f32))
    assert jnp.allclose(y_bf.astype(f32), ref_bf, atol=6e-2, rtol=6e-2), "bf16 mismatch"

    y = y_flat.reshape(batch, seq, embed_dim)  # module-shaped output
    jax.block_until_ready(y)
    print("KERNEL_OK")
</pallas_src>

<mosaic_0001>
module attributes {stable_mosaic.version = 11 : i64} {
  func.func @_gpt_ffn_kernel(%arg0: i32, %arg1: i32, %arg2: memref<16x128xf32, #tpu.memory_space<vmem>>, %arg3: memref<128x512xf32, #tpu.memory_space<vmem>>, %arg4: memref<1x512xf32, #tpu.memory_space<vmem>>, %arg5: memref<512x128xf32, #tpu.memory_space<vmem>>, %arg6: memref<1x128xf32, #tpu.memory_space<vmem>>, %arg7: memref<16x128xf32, #tpu.memory_space<vmem>>, %arg8: memref<16x128xf32, #tpu.memory_space<vmem>>) attributes {dimension_semantics = [#tpu.dimension_semantics<parallel>, #tpu.dimension_semantics<arbitrary>], iteration_bounds = array<i64: 1, 1>, scalar_prefetch = 0 : i64, scratch_operands = 1 : i64, tpu.core_type = #tpu.core_type<tc>, window_params = [{transform_indices = @transform_0, window_bounds = array<i64: 16, 128>}, {transform_indices = @transform_1, window_bounds = array<i64: 128, 512>}, {transform_indices = @transform_2, window_bounds = array<i64: 1, 512>}, {transform_indices = @transform_3, window_bounds = array<i64: 512, 128>}, {pipeline_mode = #tpu.pipeline_mode<synchronous>, transform_indices = @transform_4, window_bounds = array<i64: 1, 128>}, {transform_indices = @transform_5, window_bounds = array<i64: 16, 128>}]} {
    %c0 = arith.constant 0 : index
    %c0_0 = arith.constant 0 : index
    %0 = vector.load %arg2[%c0, %c0_0] : memref<16x128xf32, #tpu.memory_space<vmem>>, vector<16x128xf32>
    %c0_1 = arith.constant 0 : index
    %c0_2 = arith.constant 0 : index
    %1 = vector.load %arg3[%c0_1, %c0_2] : memref<128x512xf32, #tpu.memory_space<vmem>>, vector<128x256xf32>
    %c0_3 = arith.constant 0 : index
    %c0_4 = arith.constant 0 : index
    %2 = vector.load %arg4[%c0_3, %c0_4] : memref<1x512xf32, #tpu.memory_space<vmem>>, vector<1x256xf32>
    %c0_5 = arith.constant 0 : index
    %c0_6 = arith.constant 0 : index
    %3 = vector.load %arg5[%c0_5, %c0_6] : memref<512x128xf32, #tpu.memory_space<vmem>>, vector<256x128xf32>
    %cst = arith.constant dense<0.000000e+00> : vector<16x256xf32>
    %4 = tpu.matmul %0, %1, %cst {dimension_numbers = #tpu.dot_dimension_numbers<[1], [0], [0], [1], [0, 0, 1, 1], [], []>} : vector<16x128xf32>, vector<128x256xf32>, vector<16x256xf32> -> vector<16x256xf32>
    %5 = vector.broadcast %2 : vector<1x256xf32> to vector<16x256xf32>
    %6 = arith.addf %4, %5 : vector<16x256xf32>
    %cst_7 = arith.constant 5.000000e-01 : f32
    %7 = vector.broadcast %cst_7 : f32 to vector<16x256xf32>
    %8 = arith.mulf %7, %6 : vector<16x256xf32>
    %9 = arith.mulf %6, %6 : vector<16x256xf32>
    %10 = arith.mulf %9, %6 : vector<16x256xf32>
    %cst_8 = arith.constant 4.471500e-02 : f32
    %11 = vector.broadcast %cst_8 : f32 to vector<16x256xf32>
    %12 = arith.mulf %11, %10 : vector<16x256xf32>
    %13 = arith.addf %6, %12 : vector<16x256xf32>
    %cst_9 = arith.constant 0.797884583 : f32
    %14 = vector.broadcast %cst_9 : f32 to vector<16x256xf32>
    %15 = arith.mulf %14, %13 : vector<16x256xf32>
    %16 = math.tanh %15 : vector<16x256xf32>
    %cst_10 = arith.constant 1.000000e+00 : f32
    %17 = vector.broadcast %cst_10 : f32 to vector<16x256xf32>
    %18 = arith.addf %17, %16 : vector<16x256xf32>
    %19 = arith.mulf %8, %18 : vector<16x256xf32>
    %cst_11 = arith.constant dense<0.000000e+00> : vector<16x128xf32>
    %20 = tpu.matmul %19, %3, %cst_11 {dimension_numbers = #tpu.dot_dimension_numbers<[1], [0], [0], [1], [0, 0, 1, 1], [], []>} : vector<16x256xf32>, vector<256x128xf32>, vector<16x128xf32> -> vector<16x128xf32>
    %c0_12 = arith.constant 0 : index
    %c256 = arith.constant 256 : index
    %21 = vector.load %arg3[%c0_12, %c256] : memref<128x512xf32, #tpu.memory_space<vmem>>, vector<128x256xf32>
    %c0_13 = arith.constant 0 : index
    %c256_14 = arith.constant 256 : index
    %22 = vector.load %arg4[%c0_13, %c256_14] : memref<1x512xf32, #tpu.memory_space<vmem>>, vector<1x256xf32>
    %c256_15 = arith.constant 256 : index
    %c0_16 = arith.constant 0 : index
    %23 = vector.load %arg5[%c256_15, %c0_16] : memref<512x128xf32, #tpu.memory_space<vmem>>, vector<256x128xf32>
    %cst_17 = arith.constant dense<0.000000e+00> : vector<16x256xf32>
    %24 = tpu.matmul %0, %21, %cst_17 {dimension_numbers = #tpu.dot_dimension_numbers<[1], [0], [0], [1], [0, 0, 1, 1], [], []>} : vector<16x128xf32>, vector<128x256xf32>, vector<16x256xf32> -> vector<16x256xf32>
    %25 = vector.broadcast %22 : vector<1x256xf32> to vector<16x256xf32>
    %26 = arith.addf %24, %25 : vector<16x256xf32>
    %cst_18 = arith.constant 5.000000e-01 : f32
    %27 = vector.broadcast %cst_18 : f32 to vector<16x256xf32>
    %28 = arith.mulf %27, %26 : vector<16x256xf32>
    %29 = arith.mulf %26, %26 : vector<16x256xf32>
    %30 = arith.mulf %29, %26 : vector<16x256xf32>
    %cst_19 = arith.constant 4.471500e-02 : f32
    %31 = vector.broadcast %cst_19 : f32 to vector<16x256xf32>
    %32 = arith.mulf %31, %30 : vector<16x256xf32>
    %33 = arith.addf %26, %32 : vector<16x256xf32>
    %cst_20 = arith.constant 0.797884583 : f32
    %34 = vector.broadcast %cst_20 : f32 to vector<16x256xf32>
    %35 = arith.mulf %34, %33 : vector<16x256xf32>
    %36 = math.tanh %35 : vector<16x256xf32>
    %cst_21 = arith.constant 1.000000e+00 : f32
    %37 = vector.broadcast %cst_21 : f32 to vector<16x256xf32>
    %38 = arith.addf %37, %36 : vector<16x256xf32>
    %39 = arith.mulf %28, %38 : vector<16x256xf32>
    %cst_22 = arith.constant dense<0.000000e+00> : vector<16x128xf32>
    %40 = tpu.matmul %39, %23, %cst_22 {dimension_numbers = #tpu.dot_dimension_numbers<[1], [0], [0], [1], [0, 0, 1, 1], [], []>} : vector<16x256xf32>, vector<256x128xf32>, vector<16x128xf32> -> vector<16x128xf32>
    %41 = arith.addf %20, %40 : vector<16x128xf32>
    %c0_i32 = arith.constant 0 : i32
    %42 = arith.cmpi eq, %arg1, %c0_i32 : i32
    %43 = arith.extui %42 : i1 to i32
    %c0_i32_23 = arith.constant 0 : i32
    %44 = arith.cmpi ne, %43, %c0_i32_23 : i32
    scf.if %44 {
      %c0_28 = arith.constant 0 : index
      %c0_29 = arith.constant 0 : index
      %51 = vector.load %arg8[%c0_28, %c0_29] : memref<16x128xf32, #tpu.memory_space<vmem>>, vector<16x128xf32>
      tpu.vector_store %arg8[%c0_28, %c0_29], %41 {strides = array<i32>} : memref<16x128xf32, #tpu.memory_space<vmem>>, vector<16x128xf32>,
    } else {
    }
    %c0_i32_24 = arith.constant 0 : i32
    %45 = arith.cmpi sgt, %arg1, %c0_i32_24 : i32
    %46 = arith.extui %45 : i1 to i32
    %c0_i32_25 = arith.constant 0 : i32
    %47 = arith.cmpi ne, %46, %c0_i32_25 : i32
    scf.if %47 {
      %c0_28 = arith.constant 0 : index
      %c0_29 = arith.constant 0 : index
      %51 = vector.load %arg8[%c0_28, %c0_29] : memref<16x128xf32, #tpu.memory_space<vmem>>, vector<16x128xf32>
      %52 = arith.addf %51, %41 : vector<16x128xf32>
      %c0_30 = arith.constant 0 : index
      %c0_31 = arith.constant 0 : index
      %53 = vector.load %arg8[%c0_30, %c0_31] : memref<16x128xf32, #tpu.memory_space<vmem>>, vector<16x128xf32>
      tpu.vector_store %arg8[%c0_30, %c0_31], %52 {strides = array<i32>} : memref<16x128xf32, #tpu.memory_space<vmem>>, vector<16x128xf32>,
    } else {
    }
    %c0_i32_26 = arith.constant 0 : i32
    %48 = arith.cmpi eq, %arg1, %c0_i32_26 : i32
    %49 = arith.extui %48 : i1 to i32
    %c0_i32_27 = arith.constant 0 : i32
    %50 = arith.cmpi ne, %49, %c0_i32_27 : i32
    scf.if %50 {
      %c0_28 = arith.constant 0 : index
      %c0_29 = arith.constant 0 : index
      %51 = vector.load %arg8[%c0_28, %c0_29] : memref<16x128xf32, #tpu.memory_space<vmem>>, vector<16x128xf32>
      %c0_30 = arith.constant 0 : index
      %c0_31 = arith.constant 0 : index
      %52 = vector.load %arg6[%c0_30, %c0_31] : memref<1x128xf32, #tpu.memory_space<vmem>>, vector<1x128xf32>
      %53 = vector.broadcast %52 : vector<1x128xf32> to vector<16x128xf32>
      %54 = arith.addf %51, %53 : vector<16x128xf32>
      %c0_32 = arith.constant 0 : index
      %c0_33 = arith.constant 0 : index
      %55 = vector.load %arg7[%c0_32, %c0_33] : memref<16x128xf32, #tpu.memory_space<vmem>>, vector<16x128xf32>
      tpu.vector_store %arg7[%c0_32, %c0_33], %54 {strides = array<i32>} : memref<16x128xf32, #tpu.memory_space<vmem>>, vector<16x128xf32>,
    } else {
    }
    return
  }
  func.func @transform_0(%arg0: i32, %arg1: i32) -> (i32, i32) {
    %c0_i32 = arith.constant 0 : i32
    %c0_i32_0 = arith.constant 0 : i32
    return %arg0, %c0_i32 : i32, i32
  }
  func.func @transform_1(%arg0: i32, %arg1: i32) -> (i32, i32) {
    %c0_i32 = arith.constant 0 : i32
    %c0_i32_0 = arith.constant 0 : i32
    return %c0_i32, %arg1 : i32, i32
  }
  func.func @transform_2(%arg0: i32, %arg1: i32) -> (i32, i32) {
    %c0_i32 = arith.constant 0 : i32
    %c0_i32_0 = arith.constant 0 : i32
    return %c0_i32, %arg1 : i32, i32
  }
  func.func @transform_3(%arg0: i32, %arg1: i32) -> (i32, i32) {
    %c0_i32 = arith.constant 0 : i32
    %c0_i32_0 = arith.constant 0 : i32
    return %arg1, %c0_i32 : i32, i32
  }
  func.func @transform_4(%arg0: i32, %arg1: i32) -> (i32, i32) {
    %c0_i32 = arith.constant 0 : i32
    %c0_i32_0 = arith.constant 0 : i32
    %c0_i32_1 = arith.constant 0 : i32
    return %c0_i32, %c0_i32_0 : i32, i32
  }
  func.func @transform_5(%arg0: i32, %arg1: i32) -> (i32, i32) {
    %c0_i32 = arith.constant 0 : i32
    %c0_i32_0 = arith.constant 0 : i32
    return %arg0, %c0_i32 : i32, i32
  }
}

</mosaic_0001>

<bundles_post_ra>
// kernel: tpu_custom_call.1
= control target key start
LH: loop header
LB: loop body
LE: loop exit
PB: predicated region body
PF: predicated region fallthrough
CT: control target
= control target key end

     0   :  { %10 = vsyncpa [#allocation4], 0  ;;  %s1117_s0 = inlined_call_operand.hbm [shape: f32[16,128], index: 0, kind: input, shape index: {}]   ;;  %s1118_s1 = inlined_call_operand.hbm [shape: f32[128,512], index: 1, kind: input, shape index: {}]   ;;  %s1119_s2 = inlined_call_operand.vmem [shape: f32[1,512], index: 2, kind: input, shape index: {}]   ;;  %s1120_s3 = inlined_call_operand.hbm [shape: f32[512,128], index: 3, kind: input, shape index: {}]   ;;  %s1121_s4 = inlined_call_operand.vmem [shape: f32[1,128], index: 4, kind: input, shape index: {}]   ;;  %s1122_s5 = inlined_call_operand.hbm [shape: f32[16,128], index: 5, kind: output, shape index: {}]  }
   0x1   :  { %11 = vsyncpa [#allocation7], 0 }
   0x2   :  { %12 = vsyncpa [#allocation5], 0  ;;  %s966_s18 = smov [#allocation6]   ;;  %s872_s22 = scalar_lea.hbm %s1118_s1, 8192 }
   0x3   :  { %s30_s19 = sshll.u32 %s966_s18, 4  ;;  %p873_p0 = scmp.ne.s32.totalorder %s1118_s1, %s872_s22  ;;  %s31_s19 = int_to_ptr.vmem [resolvable:$true] %s30_s19 }
   0x4   :  { %p876_p1 = scmp.lt.u32.totalorder %s872_s22, %s1118_s1 }
   0x6   :  { %p878_p2 = pnand %p876_p1, %p873_p0 }
   0x8   :  { %881 = shalt.err (!%p878_p2)
}
   0x9   :  { %s882_s27 = scalar_lea.vmem %s31_s19, 8192  ;;  %p887_p4 = scmp.lt.s32.totalorder %s31_s19, %s31_s19 }
   0xa   :  { %p883_p3 = scmp.ne.s32.totalorder %s31_s19, %s882_s27  ;;  %p888_p5 = scmp.lt.s32.totalorder %s882_s27, %s882_s27 }
   0xc   :  { %p889_p6 = por %p888_p5, %p887_p4 }
   0xe   :  { %p890_p7 = pnand %p889_p6, %p883_p3 }
  0x10   :  { %893 = shalt.err (!%p890_p7)
}
  0x11   :  { %s967_s28 = smov 512   ;;  %s968_s29 = smov 32  }
  0x12   :  { %36 = dma.hbm_to_vmem [thread:$0]  %s1118_s1, 8192, %s31_s19, [#allocation7], %s967_s28, %s967_s28, %s968_s29  }
  0x13   :  { %s969_s7 = smov [#allocation3]   ;;  %s894_s11 = scalar_lea.hbm %s1117_s0, 256 }
  0x14   :  { %s18_s8 = sshll.u32 %s969_s7, 4  ;;  %p895_p8 = scmp.ne.s32.totalorder %s1117_s0, %s894_s11  ;;  %s19_s8 = int_to_ptr.vmem [resolvable:$true] %s18_s8 }
  0x15   :  { %p898_p9 = scmp.lt.u32.totalorder %s894_s11, %s1117_s0 }
  0x17   :  { %p900_p10 = pnand %p898_p9, %p895_p8 }
  0x19   :  { %903 = shalt.err (!%p900_p10)
}
  0x1a   :  { %s904_s16 = scalar_lea.vmem %s19_s8, 256  ;;  %p909_p12 = scmp.lt.s32.totalorder %s19_s8, %s19_s8 }
  0x1b   :  { %p905_p11 = scmp.ne.s32.totalorder %s19_s8, %s904_s16  ;;  %p910_p13 = scmp.lt.s32.totalorder %s904_s16, %s904_s16 }
  0x1d   :  { %p911_p0 = por %p910_p13, %p909_p12 }
  0x1f   :  { %p912_p1 = pnand %p911_p0, %p905_p11 }
  0x21   :  { %915 = shalt.err (!%p912_p1)
}
  0x22   :  { %s970_s1 = smov 128   ;;  %s971_s17 = smov 8  }
  0x23   :  { %24 = dma.hbm_to_vmem [thread:$0]  %s1117_s0, 256, %s19_s8, [#allocation4], %s970_s1, %s970_s1, %s971_s17  }
  0x24   :  { %s972_s20 = smov [#allocation8]   ;;  %s916_s24 = scalar_lea.hbm %s1120_s3, 8192 }
  0x25   :  { %s44_s21 = sshll.u32 %s972_s20, 4  ;;  %p917_p2 = scmp.ne.s32.totalorder %s1120_s3, %s916_s24  ;;  %s45_s21 = int_to_ptr.vmem [resolvable:$true] %s44_s21 }
  0x26   :  { %p920_p3 = scmp.lt.u32.totalorder %s916_s24, %s1120_s3 }
  0x28   :  { %p922_p4 = pnand %p920_p3, %p917_p2 }
  0x2a   :  { %925 = shalt.err (!%p922_p4)
}
  0x2b   :  { %s926_s29 = scalar_lea.vmem %s45_s21, 8192  ;;  %p931_p6 = scmp.lt.s32.totalorder %s45_s21, %s45_s21 }
  0x2c   :  { %p927_p5 = scmp.ne.s32.totalorder %s45_s21, %s926_s29  ;;  %p932_p7 = scmp.lt.s32.totalorder %s926_s29, %s926_s29 }
  0x2e   :  { %p933_p8 = por %p932_p7, %p931_p6 }
  0x30   :  { %p934_p9 = pnand %p933_p8, %p927_p5 }
  0x32   :  { %937 = shalt.err (!%p934_p9)
}
  0x33   :  { %50 = dma.hbm_to_vmem [thread:$0]  %s1120_s3, 8192, %s45_s21, [#allocation7], %s970_s1, %s970_s1, %s971_s17  }
  0x34   :  { %960 = dma.done.wait [#allocation4], 256  }
  0x35   :  { %961 = vsyncadd [#allocation4], 4294967040 }
  0x36   :  { %962 = dma.done.wait [#allocation7], 16384  }
  0x37   :  { %963 = vsyncadd [#allocation7], 4294950912  ;;  %v973_v0 = vmov 0.0   ;;  %v65_v1 = vld [vmem:[#allocation6 + $0x8] sm:$0xff]  ;;  %v254_v3 = vld [vmem:[#allocation6 + $0x18] sm:$0xff]  ;;  %s974_s10 = smov [#allocation9]  }
  0x38   :  { %204 = vmatprep.mubr.f32.mxu0 %v973_v0  ;;  %393 = vmatprep.mubr.f32.mxu1 %v973_v0  ;;  %v67_v2 = vld [vmem:[#allocation6 + $0x28] sm:$0xff]  ;;  %v256_v5 = vld [vmem:[#allocation6 + $0x38] sm:$0xff]  ;;  %v64_v6 = vld [vmem:[#allocation6] sm:$0xff]  ;;  %s629_s11 = sshll.u32 %s974_s10, 4  ;;  %s630_s11 = int_to_ptr.vmem [resolvable:$true] %s629_s11 }
  0x39   :  { %v719_v4 = vpack.c.bf16 %v67_v2, %v65_v1  ;;  %v66_v7 = vld [vmem:[#allocation6 + $0x20] sm:$0xff]  ;;  %v751_v8 = vpack.c.bf16 %v256_v5, %v254_v3  ;;  %v253_v10 = vld [vmem:[#allocation6 + $0x10] sm:$0xff]  ;;  %v69_v12 = vld [vmem:[#allocation6 + $0x48] sm:$0xff]  ;;  %s938_s12 = scalar_lea.vmem %s630_s11, 256  ;;  %p943_p11 = scmp.lt.s32.totalorder %s630_s11, %s630_s11 }
  0x3a   :  { %v721_v9 = vpack.c.bf16 %v66_v7, %v64_v6  ;;  %v255_v11 = vld [vmem:[#allocation6 + $0x30] sm:$0xff]  ;;  %v71_v14 = vld [vmem:[#allocation6 + $0x68] sm:$0xff]  ;;  %v258_v15 = vld [vmem:[#allocation6 + $0x58] sm:$0xff]  ;;  %p939_p10 = scmp.ne.s32.totalorder %s630_s11, %s938_s12  ;;  %p944_p12 = scmp.lt.s32.totalorder %s938_s12, %s938_s12 }
  0x3b   :  { %720 = vmatprep.subr.bf16.mxu0 %v719_v4  ;;  %v753_v13 = vpack.c.bf16 %v255_v11, %v253_v10  ;;  %v260_v16 = vld [vmem:[#allocation6 + $0x78] sm:$0xff]  ;;  %752 = vmatprep.subr.bf16.mxu1 %v751_v8  ;;  %v723_v17 = vpack.c.bf16 %v71_v14, %v69_v12  ;;  %v68_v19 = vld [vmem:[#allocation6 + $0x40] sm:$0xff]  ;;  %v257_v21 = vld [vmem:[#allocation6 + $0x50] sm:$0xff] }
  0x3c   :  { %722 = vmatpush1.bf16.msra.mxu0 %v721_v9  ;;  %v755_v18 = vpack.c.bf16 %v260_v16, %v258_v15  ;;  %v70_v20 = vld [vmem:[#allocation6 + $0x60] sm:$0xff]  ;;  %v259_v23 = vld [vmem:[#allocation6 + $0x70] sm:$0xff]  ;;  %v73_v24 = vld [vmem:[#allocation6 + $0x88] sm:$0xff]  ;;  %p945_p13 = por %p944_p12, %p943_p11 }
  0x3d   :  { %754 = vmatpush1.bf16.msra.mxu1 %v753_v13  ;;  %v725_v22 = vpack.c.bf16 %v70_v20, %v68_v19  ;;  %v75_v25 = vld [vmem:[#allocation6 + $0xa8] sm:$0xff]  ;;  %724 = vmatprep.subr.bf16.mxu0 %v723_v17  ;;  %v757_v26 = vpack.c.bf16 %v259_v23, %v257_v21  ;;  %v262_v28 = vld [vmem:[#allocation6 + $0x98] sm:$0xff]  ;;  %v72_v30 = vld [vmem:[#allocation6 + $0x80] sm:$0xff] }
  0x3e   :  { %756 = vmatprep.subr.bf16.mxu1 %v755_v18  ;;  %v727_v27 = vpack.c.bf16 %v75_v25, %v73_v24  ;;  %v264_v29 = vld [vmem:[#allocation6 + $0xb8] sm:$0xff]  ;;  %v74_v32 = vld [vmem:[#allocation6 + $0xa0] sm:$0xff]  ;;  %v261_v33 = vld [vmem:[#allocation6 + $0x90] sm:$0xff]  ;;  %p946_p0 = pnand %p945_p13, %p939_p10 }
  0x3f   :  { %v759_v31 = vpack.c.bf16 %v264_v29, %v262_v28  ;;  %v263_v34 = vld [vmem:[#allocation6 + $0xb0] sm:$0xff]  ;;  %v729_v35 = vpack.c.bf16 %v74_v32, %v72_v30  ;;  %v77_v36 = vld [vmem:[#allocation6 + $0xc8] sm:$0xff]  ;;  %v266_v38 = vld [vmem:[#allocation6 + $0xd8] sm:$0xff] }
  0x40   :  { %726 = vmatpush1.bf16.msra.mxu0 %v725_v22  ;;  %v79_v37 = vld [vmem:[#allocation6 + $0xe8] sm:$0xff]  ;;  %v761_v39 = vpack.c.bf16 %v263_v34, %v261_v33  ;;  %v268_v41 = vld [vmem:[#allocation6 + $0xf8] sm:$0xff]  ;;  %v76_v42 = vld [vmem:[#allocation6 + $0xc0] sm:$0xff] }
  0x41   :  { %758 = vmatpush1.bf16.msra.mxu1 %v757_v26  ;;  %728 = vmatprep.subr.bf16.mxu0 %v727_v27  ;;  %v731_v40 = vpack.c.bf16 %v79_v37, %v77_v36  ;;  %v78_v43 = vld [vmem:[#allocation6 + $0xe0] sm:$0xff]  ;;  %v763_v44 = vpack.c.bf16 %v268_v41, %v266_v38  ;;  %v265_v45 = vld [vmem:[#allocation6 + $0xd0] sm:$0xff]  ;;  %v81_v47 = vld [vmem:[#allocation6 + $0x108] sm:$0xff] }
  0x42   :  { %760 = vmatprep.subr.bf16.mxu1 %v759_v31  ;;  %v267_v46 = vld [vmem:[#allocation6 + $0xf0] sm:$0xff]  ;;  %v83_v48 = vld [vmem:[#allocation6 + $0x128] sm:$0xff]  ;;  %v270_v49 = vld [vmem:[#allocation6 + $0x118] sm:$0xff]  ;;  %v733_v51 = vpack.c.bf16 %v78_v43, %v76_v42 }
  0x43   :  { %v272_v50 = vld [vmem:[#allocation6 + $0x138] sm:$0xff]  ;;  %v765_v52 = vpack.c.bf16 %v267_v46, %v265_v45  ;;  %v735_v53 = vpack.c.bf16 %v83_v48, %v81_v47  ;;  %v80_v54 = vld [vmem:[#allocation6 + $0x100] sm:$0xff]  ;;  %v269_v56 = vld [vmem:[#allocation6 + $0x110] sm:$0xff] }
  0x44   :  { %730 = vmatpush1.bf16.msra.mxu0 %v729_v35  ;;  %v82_v55 = vld [vmem:[#allocation6 + $0x120] sm:$0xff]  ;;  %v767_v57 = vpack.c.bf16 %v272_v50, %v270_v49  ;;  %v271_v58 = vld [vmem:[#allocation6 + $0x130] sm:$0xff]  ;;  %v85_v59 = vld [vmem:[#allocation6 + $0x148] sm:$0xff] }
  0x45   :  { %762 = vmatpush1.bf16.msra.mxu1 %v761_v39  ;;  %732 = vmatprep.subr.bf16.mxu0 %v731_v40  ;;  %v87_v60 = vld [vmem:[#allocation6 + $0x168] sm:$0xff]  ;;  %v274_v61 = vld [vmem:[#allocation6 + $0x158] sm:$0xff]  ;;  %v737_v63 = vpack.c.bf16 %v82_v55, %v80_v54  ;;  %v769_v1 = vpack.c.bf16 %v271_v58, %v269_v56  ;;  %v84_v3 = vld [vmem:[#allocation6 + $0x140] sm:$0xff] }
  0x46   :  { %764 = vmatprep.subr.bf16.mxu1 %v763_v44  ;;  %v276_v62 = vld [vmem:[#allocation6 + $0x178] sm:$0xff]  ;;  %v739_v2 = vpack.c.bf16 %v87_v60, %v85_v59  ;;  %v86_v4 = vld [vmem:[#allocation6 + $0x160] sm:$0xff]  ;;  %v273_v5 = vld [vmem:[#allocation6 + $0x150] sm:$0xff] }
  0x47   :  { %v771_v6 = vpack.c.bf16 %v276_v62, %v274_v61  ;;  %v275_v7 = vld [vmem:[#allocation6 + $0x170] sm:$0xff]  ;;  %v89_v8 = vld [vmem:[#allocation6 + $0x188] sm:$0xff]  ;;  %v278_v10 = vld [vmem:[#allocation6 + $0x198] sm:$0xff]  ;;  %v741_v12 = vpack.c.bf16 %v86_v4, %v84_v3 }
  0x48   :  { %734 = vmatpush1.bf16.msra.mxu0 %v733_v51  ;;  %v91_v9 = vld [vmem:[#allocation6 + $0x1a8] sm:$0xff]  ;;  %v280_v11 = vld [vmem:[#allocation6 + $0x1b8] sm:$0xff]  ;;  %v773_v13 = vpack.c.bf16 %v275_v7, %v273_v5  ;;  %v88_v15 = vld [vmem:[#allocation6 + $0x180] sm:$0xff] }
  0x49   :  { %766 = vmatpush1.bf16.msra.mxu1 %v765_v52  ;;  %736 = vmatprep.subr.bf16.mxu0 %v735_v53  ;;  %v743_v14 = vpack.c.bf16 %v91_v9, %v89_v8  ;;  %v90_v16 = vld [vmem:[#allocation6 + $0x1a0] sm:$0xff]  ;;  %v277_v17 = vld [vmem:[#allocation6 + $0x190] sm:$0xff]  ;;  %v775_v18 = vpack.c.bf16 %v280_v11, %v278_v10  ;;  %v93_v20 = vld [vmem:[#allocation6 + $0x1c8] sm:$0xff] }
  0x4a   :  { %768 = vmatprep.subr.bf16.mxu1 %v767_v57  ;;  %v279_v19 = vld [vmem:[#allocation6 + $0x1b0] sm:$0xff]  ;;  %v95_v21 = vld [vmem:[#allocation6 + $0x1e8] sm:$0xff]  ;;  %v282_v22 = vld [vmem:[#allocation6 + $0x1d8] sm:$0xff]  ;;  %v745_v24 = vpack.c.bf16 %v90_v16, %v88_v15 }
  0x4b   :  { %v284_v23 = vld [vmem:[#allocation6 + $0x1f8] sm:$0xff]  ;;  %v777_v25 = vpack.c.bf16 %v279_v19, %v277_v17  ;;  %v747_v26 = vpack.c.bf16 %v95_v21, %v93_v20  ;;  %v92_v27 = vld [vmem:[#allocation6 + $0x1c0] sm:$0xff]  ;;  %v281_v29 = vld [vmem:[#allocation6 + $0x1d0] sm:$0xff] }
  0x4c   :  { %738 = vmatpush1.bf16.msra.mxu0 %v737_v63  ;;  %v94_v28 = vld [vmem:[#allocation6 + $0x1e0] sm:$0xff]  ;;  %v779_v30 = vpack.c.bf16 %v284_v23, %v282_v22  ;;  %v283_v31 = vld [vmem:[#allocation6 + $0x1f0] sm:$0xff]  ;;  %v303_v33 = vld [vmem:[#allocation8 + $0x188] sm:$0xff] }
  0x4d   :  { %770 = vmatpush1.bf16.msra.mxu1 %v769_v1  ;;  %740 = vmatprep.subr.bf16.mxu0 %v739_v2  ;;  %v302_v32 = vld [vmem:[#allocation8 + $0x180] sm:$0xff]  ;;  %v114_v35 = vld [vmem:[#allocation8 + $0x88] sm:$0xff]  ;;  %v749_v36 = vpack.c.bf16 %v94_v28, %v92_v27  ;;  %v781_v37 = vpack.c.bf16 %v283_v31, %v281_v29  ;;  %v62_v44 = vld [vmem:[#allocation3] sm:$0xff] }
  0x4e   :  { %772 = vmatprep.subr.bf16.mxu1 %v771_v6  ;;  %v113_v34 = vld [vmem:[#allocation8 + $0x80] sm:$0xff]  ;;  %v783_v38 = vpack.c.bf16 %v303_v33, %v302_v32  ;;  %v287_v41 = vld [vmem:[#allocation8 + $0x108] sm:$0xff]  ;;  %v63_v47 = vld [vmem:[#allocation3 + $0x8] sm:$0xff] }
  0x4f   :  { %v815_v39 = vpack.c.bf16 %v114_v35, %v113_v34  ;;  %v286_v40 = vld [vmem:[#allocation8 + $0x100] sm:$0xff]  ;;  %v98_v43 = vld [vmem:[#allocation8 + $0x8] sm:$0xff]  ;;  %v304_v48 = vld [vmem:[#allocation8 + $0x190] sm:$0xff] }
  0x50   :  { %742 = vmatpush1.bf16.msra.mxu0 %v741_v12  ;;  %v97_v42 = vld [vmem:[#allocation8] sm:$0xff]  ;;  %v785_v45 = vpack.c.bf16 %v287_v41, %v286_v40  ;;  %v305_v49 = vld [vmem:[#allocation8 + $0x198] sm:$0xff]  ;;  %v115_v50 = vld [vmem:[#allocation8 + $0x90] sm:$0xff] }
  0x51   :  { %774 = vmatpush1.bf16.msra.mxu1 %v773_v13  ;;  %744 = vmatprep.subr.bf16.mxu0 %v743_v14  ;;  %v817_v46 = vpack.c.bf16 %v98_v43, %v97_v42  ;;  %v787_v51 = vpack.c.bf16 %v305_v49, %v304_v48  ;;  %v116_v52 = vld [vmem:[#allocation8 + $0x98] sm:$0xff]  ;;  %v288_v53 = vld [vmem:[#allocation8 + $0x110] sm:$0xff]  ;;  %v307_v60 = vld [vmem:[#allocation8 + $0x1a8] sm:$0xff] }
  0x52   :  { %776 = vmatprep.subr.bf16.mxu1 %v775_v18  ;;  %v289_v54 = vld [vmem:[#allocation8 + $0x118] sm:$0xff]  ;;  %v819_v55 = vpack.c.bf16 %v116_v52, %v115_v50  ;;  %v99_v57 = vld [vmem:[#allocation8 + $0x10] sm:$0xff]  ;;  %v117_v61 = vld [vmem:[#allocation8 + $0xa0] sm:$0xff] }
  0x53   :  { %v789_v56 = vpack.c.bf16 %v289_v54, %v288_v53  ;;  %v100_v58 = vld [vmem:[#allocation8 + $0x18] sm:$0xff]  ;;  %v118_v63 = vld [vmem:[#allocation8 + $0xa8] sm:$0xff]  ;;  %v290_v1 = vld [vmem:[#allocation8 + $0x120] sm:$0xff] }
  0x54   :  { %746 = vmatpush1.bf16.msra.mxu0 %v745_v24  ;;  %v821_v59 = vpack.c.bf16 %v100_v58, %v99_v57  ;;  %v291_v2 = vld [vmem:[#allocation8 + $0x128] sm:$0xff]  ;;  %v823_v3 = vpack.c.bf16 %v118_v63, %v117_v61  ;;  %v101_v5 = vld [vmem:[#allocation8 + $0x20] sm:$0xff]  ;;  %v308_v8 = vld [vmem:[#allocation8 + $0x1b0] sm:$0xff] }
  0x55   :  { %778 = vmatpush1.bf16.msra.mxu1 %v777_v25  ;;  %748 = vmatprep.subr.bf16.mxu0 %v747_v26  ;;  %v793_v4 = vpack.c.bf16 %v291_v2, %v290_v1  ;;  %v102_v6 = vld [vmem:[#allocation8 + $0x28] sm:$0xff]  ;;  %v309_v9 = vld [vmem:[#allocation8 + $0x1b8] sm:$0xff]  ;;  %v119_v10 = vld [vmem:[#allocation8 + $0xb0] sm:$0xff] }
  0x56   :  { %780 = vmatprep.subr.bf16.mxu1 %v779_v30  ;;  %v825_v7 = vpack.c.bf16 %v102_v6, %v101_v5  ;;  %v795_v11 = vpack.c.bf16 %v309_v9, %v308_v8  ;;  %v120_v12 = vld [vmem:[#allocation8 + $0xb8] sm:$0xff]  ;;  %v292_v13 = vld [vmem:[#allocation8 + $0x130] sm:$0xff]  ;;  %v310_v20 = vld [vmem:[#allocation8 + $0x1c0] sm:$0xff] }
  0x57   :  { %v293_v14 = vld [vmem:[#allocation8 + $0x138] sm:$0xff]  ;;  %v827_v15 = vpack.c.bf16 %v120_v12, %v119_v10  ;;  %v103_v17 = vld [vmem:[#allocation8 + $0x30] sm:$0xff]  ;;  %v311_v21 = vld [vmem:[#allocation8 + $0x1c8] sm:$0xff] }
  0x58   :  { %750 = vmatpush1.bf16.msra.mxu0 %v749_v36  ;;  %v797_v16 = vpack.c.bf16 %v293_v14, %v292_v13  ;;  %v104_v18 = vld [vmem:[#allocation8 + $0x38] sm:$0xff]  ;;  %v121_v22 = vld [vmem:[#allocation8 + $0xc0] sm:$0xff]  ;;  %v799_v23 = vpack.c.bf16 %v311_v21, %v310_v20  ;;  %v122_v24 = vld [vmem:[#allocation8 + $0xc8] sm:$0xff] }
  0x59   :  { %782 = vmatpush1.bf16.msra.mxu1 %v781_v37  ;;  %784 = vmatprep.subr.bf16.mxu0 %v783_v38  ;;  %v829_v19 = vpack.c.bf16 %v104_v18, %v103_v17  ;;  %v294_v25 = vld [vmem:[#allocation8 + $0x140] sm:$0xff]  ;;  %v295_v26 = vld [vmem:[#allocation8 + $0x148] sm:$0xff]  ;;  %v831_v27 = vpack.c.bf16 %v122_v24, %v121_v22  ;;  %v312_v32 = vld [vmem:[#allocation8 + $0x1d0] sm:$0xff] }
  0x5a   :  { %816 = vmatprep.subr.bf16.mxu1 %v815_v39  ;;  %v801_v28 = vpack.c.bf16 %v295_v26, %v294_v25  ;;  %v105_v29 = vld [vmem:[#allocation8 + $0x40] sm:$0xff]  ;;  %v106_v30 = vld [vmem:[#allocation8 + $0x48] sm:$0xff]  ;;  %v313_v33 = vld [vmem:[#allocation8 + $0x1d8] sm:$0xff] }
  0x5b   :  { %205 = vmatmul.mubr.f32.vlgmr.msra.gmra.mrb[0].mxu0 %v62_v44  ;;  %v833_v31 = vpack.c.bf16 %v106_v30, %v105_v29  ;;  %v123_v34 = vld [vmem:[#allocation8 + $0xd0] sm:$0xff]  ;;  %v803_v35 = vpack.c.bf16 %v313_v33, %v312_v32  ;;  %v124_v36 = vld [vmem:[#allocation8 + $0xd8] sm:$0xff]  ;;  %v126_v48 = vld [vmem:[#allocation8 + $0xe8] sm:$0xff] }
  0x5c   :  { %394 = vmatmul.mubr.f32.vlgmr.msra.gmra.mrb[0].mxu1 %v62_v44  ;;  %210 = vmatprep.mubr.f32.mxu0 %v973_v0  ;;  %v296_v37 = vld [vmem:[#allocation8 + $0x150] sm:$0xff]  ;;  %v297_v38 = vld [vmem:[#allocation8 + $0x158] sm:$0xff]  ;;  %v835_v39 = vpack.c.bf16 %v124_v36, %v123_v34  ;;  %v314_v44 = vld [vmem:[#allocation8 + $0x1e0] sm:$0xff] }
  0x5d   :  { %399 = vmatprep.mubr.f32.mxu1 %v973_v0  ;;  %786 = vmatpush3.bf16.msra.mxu0 %v785_v45  ;;  %v306_v0 = vld [vmem:[#allocation8 + $0x1a0] sm:$0xff]  ;;  %v805_v40 = vpack.c.bf16 %v297_v38, %v296_v37  ;;  %v107_v41 = vld [vmem:[#allocation8 + $0x50] sm:$0xff]  ;;  %v108_v42 = vld [vmem:[#allocation8 + $0x58] sm:$0xff] }
  0x5e   :  { %818 = vmatpush3.bf16.msra.mxu1 %v817_v46  ;;  %788 = vmatprep.subr.bf16.mxu0 %v787_v51  ;;  %v791_v62 = vpack.c.bf16 %v307_v60, %v306_v0  ;;  %v837_v43 = vpack.c.bf16 %v108_v42, %v107_v41  ;;  %v315_v45 = vld [vmem:[#allocation8 + $0x1e8] sm:$0xff]  ;;  %v125_v46 = vld [vmem:[#allocation8 + $0xe0] sm:$0xff]  ;;  %v317_v57 = vld [vmem:[#allocation8 + $0x1f8] sm:$0xff] }
  0x5f   :  { %211 = vmatmul.mubr.f32.gmra.mrb[2].mxu0 %v63_v47  ;;  %820 = vmatprep.subr.bf16.mxu1 %v819_v55  ;;  %v298_v49 = vld [vmem:[#allocation8 + $0x160] sm:$0xff]  ;;  %v299_v50 = vld [vmem:[#allocation8 + $0x168] sm:$0xff]  ;;  %v839_v51 = vpack.c.bf16 %v126_v48, %v125_v46  ;;  %v127_v58 = vld [vmem:[#allocation8 + $0xf0] sm:$0xff] }
  0x60   :  { %400 = vmatmul.mubr.f32.gmra.mrb[2].mxu1 %v63_v47  ;;  %v807_v47 = vpack.c.bf16 %v315_v45, %v314_v44  ;;  %v809_v52 = vpack.c.bf16 %v299_v50, %v298_v49  ;;  %v109_v53 = vld [vmem:[#allocation8 + $0x60] sm:$0xff]  ;;  %v110_v54 = vld [vmem:[#allocation8 + $0x68] sm:$0xff]  ;;  %v128_v0 = vld [vmem:[#allocation8 + $0xf8] sm:$0xff] }
  0x61   :  { %790 = vmatpush3.bf16.msra.mxu0 %v789_v56  ;;  %v841_v55 = vpack.c.bf16 %v110_v54, %v109_v53  ;;  %v316_v56 = vld [vmem:[#allocation8 + $0x1f0] sm:$0xff]  ;;  %v301_v61 = vld [vmem:[#allocation8 + $0x178] sm:$0xff] }
  0x62   :  { %822 = vmatpush3.bf16.msra.mxu1 %v821_v59  ;;  %792 = vmatprep.subr.bf16.mxu0 %v791_v62  ;;  %v811_v59 = vpack.c.bf16 %v317_v57, %v316_v56  ;;  %v300_v60 = vld [vmem:[#allocation8 + $0x170] sm:$0xff]  ;;  %v843_v62 = vpack.c.bf16 %v128_v0, %v127_v58  ;;  %v112_v2 = vld [vmem:[#allocation8 + $0x78] sm:$0xff] }
  0x63   :  { %824 = vmatprep.subr.bf16.mxu1 %v823_v3  ;;  %v813_v63 = vpack.c.bf16 %v301_v61, %v300_v60  ;;  %v111_v1 = vld [vmem:[#allocation8 + $0x70] sm:$0xff] }
  0x64   :  { %v845_v3 = vpack.c.bf16 %v112_v2, %v111_v1  ;;  %v285_v9 = vld [vmem:[%s1119_s2 + $0x2] sm:$0x3] }
  0x65   :  { %794 = vmatpush3.bf16.msra.mxu0 %v793_v4  ;;  %v130_v4 = vlaneseq }
  0x66   :  { %826 = vmatpush3.bf16.msra.mxu1 %v825_v7  ;;  %796 = vmatprep.subr.bf16.mxu0 %v795_v11  ;;  %v96_v7 = vld [vmem:[%s1119_s2] sm:$0x3] }
  0x67   :  { %828 = vmatprep.subr.bf16.mxu1 %v827_v15  ;;  %v131_v5 = vshrl.u32 %v130_v4, 7 }
  0x69   :  { %798 = vmatpush3.bf16.msra.mxu0 %v797_v16  ;;  %v132_v6 = vsub.s32 0, %v131_v5  ;;  %v136_v8 = vsub.s32 1, %v131_v5 }
  0x6a   :  { %830 = vmatpush3.bf16.msra.mxu1 %v829_v19  ;;  %800 = vmatprep.subr.bf16.mxu0 %v799_v23 }
  0x6b   :  { %832 = vmatprep.subr.bf16.mxu1 %v831_v27  ;;  %v133_v10 = vrot.slane %v96_v7, %v132_v6  ;;  %v322_v11 = vrot.slane %v285_v9, %v132_v6  ;;  %v137_v12 = vrot.slane %v96_v7, %v136_v8  ;;  %v326_v13 = vrot.slane %v285_v9, %v136_v8 }
  0x6d   :  { %802 = vmatpush3.bf16.msra.mxu0 %v801_v28 }
  0x6e   :  { %834 = vmatpush3.bf16.msra.mxu1 %v833_v31  ;;  %804 = vmatprep.subr.bf16.mxu0 %v803_v35 }
  0x6f   :  { %836 = vmatprep.subr.bf16.mxu1 %v835_v39 }
  0x71   :  { %806 = vmatpush3.bf16.msra.mxu0 %v805_v40 }
  0x72   :  { %838 = vmatpush3.bf16.msra.mxu1 %v837_v43  ;;  %808 = vmatprep.subr.bf16.mxu0 %v807_v47 }
  0x73   :  { %840 = vmatprep.subr.bf16.mxu1 %v839_v51 }
  0x75   :  { %810 = vmatpush3.bf16.msra.mxu0 %v809_v52 }
  0x76   :  { %842 = vmatpush3.bf16.msra.mxu1 %v841_v55  ;;  %812 = vmatprep.subr.bf16.mxu0 %v811_v59 }
  0x77   :  { %844 = vmatprep.subr.bf16.mxu1 %v843_v62 }
  0x79   :  { %814 = vmatpush3.bf16.msra.mxu0 %v813_v63 }
  0x7a   :  { %846 = vmatpush3.bf16.msra.mxu1 %v845_v3 }
 0x12e   :  { %v206_v14 = vpop.f32.mrb[0].mxu0 }
 0x12f   :  { %v1057_v15 = vadd.f32 %v206_v14, %v133_v10  ;;  %v395_v16 = vpop.f32.mrb[0].mxu1  ;;  %v208_v17 = vpop.f32.mrb[1].mxu0 }
 0x130   :  { %v1059_v18 = vadd.f32 %v395_v16, %v322_v11  ;;  %v1061_v19 = vadd.f32 %v208_v17, %v137_v12  ;;  %v397_v20 = vpop.f32.mrb[1].mxu1 }
 0x131   :  { %v221_v21 = vmul.f32 %v1057_v15, %v1057_v15  ;;  %v398_v22 = vadd.f32 %v397_v20, %v326_v13 }
 0x132   :  { %v410_v23 = vmul.f32 %v1059_v18, %v1059_v18  ;;  %v222_v24 = vmul.f32 %v1061_v19, %v1061_v19  ;;  %v212_v25 = vpop.f32.mrb[2].mxu0  ;;  %v406_v16 = vmul.f32 0.5, %v1059_v18  ;;  %v218_v17 = vmul.f32 0.5, %v1061_v19 }
 0x133   :  { %v225_v26 = vmul.f32 %v221_v21, %v1057_v15  ;;  %v411_v27 = vmul.f32 %v398_v22, %v398_v22  ;;  %v1070_v28 = vadd.f32 %v212_v25, %v133_v10  ;;  %v401_v29 = vpop.f32.mrb[2].mxu1  ;;  %v214_v30 = vpop.f32.mrb[3].mxu0 }
 0x134   :  { %v414_v31 = vmul.f32 %v410_v23, %v1059_v18  ;;  %v226_v32 = vmul.f32 %v222_v24, %v1061_v19  ;;  %v1074_v33 = vadd.f32 %v401_v29, %v322_v11  ;;  %v215_v34 = vadd.f32 %v214_v30, %v137_v12  ;;  %v403_v35 = vpop.f32.mrb[3].mxu1 }
 0x135   :  { %v229_v36 = vmul.f32 0.044715, %v225_v26  ;;  %v415_v37 = vmul.f32 %v411_v27, %v398_v22  ;;  %v223_v38 = vmul.f32 %v1070_v28, %v1070_v28  ;;  %v1078_v39 = vadd.f32 %v403_v35, %v326_v13 }
 0x136   :  { %v418_v40 = vmul.f32 0.044715, %v414_v31  ;;  %v230_v41 = vmul.f32 0.044715, %v226_v32  ;;  %v412_v42 = vmul.f32 %v1074_v33, %v1074_v33  ;;  %v224_v43 = vmul.f32 %v215_v34, %v215_v34 }
 0x137   :  { %v233_v44 = vadd.f32 %v229_v36, %v1057_v15  ;;  %v419_v45 = vmul.f32 0.044715, %v415_v37  ;;  %v227_v46 = vmul.f32 %v223_v38, %v1070_v28  ;;  %v413_v47 = vmul.f32 %v1078_v39, %v1078_v39 }
 0x138   :  { %v422_v48 = vadd.f32 %v418_v40, %v1059_v18  ;;  %v234_v49 = vadd.f32 %v230_v41, %v1061_v19  ;;  %v416_v50 = vmul.f32 %v412_v42, %v1074_v33  ;;  %v228_v51 = vmul.f32 %v224_v43, %v215_v34 }
 0x139   :  { %v237_v52 = vmul.f32 0.7978846, %v233_v44  ;;  %v423_v53 = vadd.f32 %v419_v45, %v398_v22  ;;  %v231_v54 = vmul.f32 0.044715, %v227_v46  ;;  %v417_v55 = vmul.f32 %v413_v47, %v1078_v39  ;;  %v642_v46 = vld [vmem:[%s1121_s4] ss:$0 sm:$0xff] }
 0x13a   :  { %v426_v56 = vmul.f32 0.7978846, %v422_v48  ;;  %v238_v57 = vmul.f32 0.7978846, %v234_v49  ;;  %v420_v58 = vmul.f32 0.044715, %v416_v50 }
 0x13b   :  { %856 = vtanh.f32 %v237_v52  ;;  %v427_v59 = vmul.f32 0.7978846, %v423_v53  ;;  %v235_v0 = vadd.f32 %v231_v54, %v1070_v28  ;;  %v232_v60 = vmul.f32 0.044715, %v228_v51 }
 0x13c   :  { %858 = vtanh.f32 %v426_v56  ;;  %v424_v61 = vadd.f32 %v420_v58, %v1074_v33  ;;  %v421_v62 = vmul.f32 0.044715, %v417_v55  ;;  %v407_v12 = vmul.f32 0.5, %v398_v22 }
 0x13d   :  { %v239_v63 = vmul.f32 0.7978846, %v235_v0  ;;  %v236_v1 = vadd.f32 %v232_v60, %v215_v34  ;;  %860 = vtanh.f32 %v427_v59  ;;  %v217_v23 = vmul.f32 0.5, %v1057_v15 }
 0x13e   :  { %v428_v2 = vmul.f32 0.7978846, %v424_v61  ;;  %v425_v3 = vadd.f32 %v421_v62, %v1078_v39  ;;  %862 = vtanh.f32 %v238_v57  ;;  %v220_v29 = vmul.f32 0.5, %v215_v34 }
 0x13f   :  { %v240_v4 = vmul.f32 0.7978846, %v236_v1  ;;  %864 = vtanh.f32 %v239_v63  ;;  %v409_v18 = vmul.f32 0.5, %v1078_v39  ;;  %v408_v15 = vmul.f32 0.5, %v1074_v33 }
 0x140   :  { %v429_v5 = vmul.f32 0.7978846, %v425_v3  ;;  %866 = vtanh.f32 %v428_v2  ;;  %v219_v37 = vmul.f32 0.5, %v1070_v28 }
 0x141   :  { %868 = vtanh.f32 %v240_v4 }
 0x142   :  { %870 = vtanh.f32 %v429_v5 }
 0x145   :  { %v857_v6 = vpop.eup %856 }
 0x146   :  { %v859_v7 = vpop.eup %858  ;;  %v245_v11 = vadd.f32 1.0, %v857_v6 }
 0x147   :  { %v861_v8 = vpop.eup %860  ;;  %v434_v9 = vadd.f32 1.0, %v859_v7 }
 0x148   :  { %v863_v10 = vpop.eup %862  ;;  %v435_v13 = vadd.f32 1.0, %v861_v8  ;;  %v249_v31 = vmul.f32 %v245_v11, %v217_v23 }
 0x149   :  { %v865_v14 = vpop.eup %864  ;;  %v246_v20 = vadd.f32 1.0, %v863_v10  ;;  %v438_v26 = vmul.f32 %v434_v9, %v406_v16 }
 0x14a   :  { %v867_v21 = vpop.eup %866  ;;  %v439_v24 = vmul.f32 %v435_v13, %v407_v12  ;;  %v247_v35 = vadd.f32 1.0, %v865_v14 }
 0x14b   :  { %v869_v25 = vpop.eup %868  ;;  %v250_v27 = vmul.f32 %v246_v20, %v218_v17  ;;  %v436_v22 = vadd.f32 1.0, %v867_v21 }
 0x14c   :  { %v871_v30 = vpop.eup %870  ;;  %506 = vmatprep.mubr.f32.mxu0 %v439_v24  ;;  %v248_v32 = vadd.f32 1.0, %v869_v25  ;;  %v251_v40 = vmul.f32 %v247_v35, %v219_v37 }
 0x14d   :  { %581 = vmatprep.mubr.f32.mxu1 %v250_v27  ;;  %507 = vmatmul.mubr.f32.vlgmr.msra.gmra.mrb[4].mxu0 %v438_v26  ;;  %v437_v19 = vadd.f32 1.0, %v871_v30  ;;  %v440_v34 = vmul.f32 %v436_v22, %v408_v15 }
 0x14e   :  { %582 = vmatmul.mubr.f32.vlgmr.msra.gmra.mrb[4].mxu1 %v249_v31  ;;  %v252_v36 = vmul.f32 %v248_v32, %v220_v29 }
 0x14f   :  { %v441_v38 = vmul.f32 %v437_v19, %v409_v18 }
 0x150   :  { %586 = vmatprep.mubr.f32.mxu1 %v252_v36 }
 0x151   :  { %511 = vmatprep.mubr.f32.mxu0 %v441_v38 }
 0x152   :  { %512 = vmatmul.mubr.f32.gmra.mrb[6].mxu0 %v440_v34  ;;  %587 = vmatmul.mubr.f32.gmra.mrb[6].mxu1 %v251_v40 }
 0x220   :  { %v675_v41 = vpop.f32.mrb[4].mxu0 }
 0x221   :  { %v713_v42 = vpop.f32.mrb[4].mxu1  ;;  %v676_v43 = vpop.f32.mrb[5].mxu0 }
 0x222   :  { %v677_v44 = vadd.f32 %v676_v43, %v675_v41  ;;  %v714_v45 = vpop.f32.mrb[5].mxu1 }
 0x223   :  { %v715_v39 = vadd.f32 %v714_v45, %v713_v42 }
 0x225   :  { %v584_v33 = vadd.f32 %v715_v39, %v677_v44  ;;  %v678_v47 = vpop.f32.mrb[6].mxu0  ;;  %v716_v28 = vpop.f32.mrb[6].mxu1 }
 0x226   :  { %v679_v48 = vpop.f32.mrb[7].mxu0  ;;  %v717_v49 = vpop.f32.mrb[7].mxu1 }
 0x227   :  { %v620_v50 = vadd.f32 %v642_v46, %v584_v33  ;;  %v680_v51 = vadd.f32 %v679_v48, %v678_v47  ;;  %v718_v52 = vadd.f32 %v717_v49, %v716_v28 }
 0x229   :  { %622 = vst [vmem:[#allocation9] sm:$0xff] %v620_v50  ;;  %v589_v53 = vadd.f32 %v718_v52, %v680_v51 }
 0x22b   :  { %v621_v54 = vadd.f32 %v642_v46, %v589_v53 }
 0x22d   :  { %623 = vst [vmem:[#allocation9 + $0x8] sm:$0xff] %v621_v54 }
 0x22e   :  { %949 = shalt.err (!%p946_p0)
}
 0x22f   :  { %s950_s14 = scalar_lea.hbm %s1122_s5, 256 }
 0x230   :  { %p951_p1 = scmp.ne.s32.totalorder %s1122_s5, %s950_s14  ;;  %p954_p2 = scmp.lt.u32.totalorder %s950_s14, %s1122_s5 }
 0x232   :  { %p956_p3 = pnand %p954_p2, %p951_p1 }
 0x234   :  { %959 = shalt.err (!%p956_p3)
}
 0x235   :  { %635 = dma.vmem_to_hbm [thread:$0]  %s630_s11, 256, %s1122_s5, [#allocation5], %s970_s1, %s970_s1, %s971_s17  }
 0x236   :  { %964 = dma.done.wait [#allocation5], 256  }
 0x237   :  { %965 = vsyncadd [#allocation5], 4294967040 }
 0x238   :  { %639 = vsyncpa [#allocation4], 1 }
 0x239   :  { %640 = vsyncpa [#allocation7], 1 }
 0x23a   :  { %641 = vsyncpa [#allocation5], 1 }

</bundles_post_ra>
